<compile_context>
chip_gen: v7x
topology: tpu7x:2x2x1
jax: 0.10.0
libtpu: 0.0.40
codegen_flags: <defaults>
</compile_context>

<pallas_src>
import math

import jax
import jax.numpy as jnp
import numpy as np
from jax.experimental import pallas as pl
from jax.experimental.pallas import tpu as pltpu  # noqa: F401  (TPU backend)


# ------------------------- fused RNNet forward kernel -------------------------

def make_fused_kernel(L, S, H, E_pad, S_pad, off_wbig, off_misc, off_s0):
    """Fused wavefront kernel over all RNN layers + Linear head.

    Ref order: x_in ((S+L-1)*8, E_pad), packed params (P, L*H), out (S_pad, 128).

    Packed-params row layout (all blocks 8-row aligned):
      [0          : E_pad     )  W_in       (E_pad, L*H)   x -> layer-0 pre
      [off_wbig   : +L*H      )  W_big      (L*H, L*H)     block recurrent matrix
      [off_misc   : +8        )  row0 = biases of all layers, row1 = w_lin
                                 (zero outside last layer), [2,0] = b_lin
      [off_s0     : +8        )  initial state [h0_0 | ... | h0_{L-1}] broadcast
    """
    LH = L * H
    W = S + L - 1                      # wavefront steps

    def kernel(x_ref, p_ref, out_ref):
        # ---- one-time loads (off the serial chain) ----
        w_in = p_ref[0:E_pad, :]                           # (E_pad, LH) f32
        misc = p_ref[off_misc:off_misc + 8, :]             # (8, LH)
        bias_full = misc[0:1, :]                           # (1, LH)  all biases
        w_lin = misc[1:2, :]                               # (1, LH)  head weights
        b_lin = misc[2:3, 0:1]                             # (1, 1)   head bias

        # Hoisted input projection + per-step bias add for every wavefront step:
        # rows [w*8:(w+1)*8] hold (x[w] @ W_ih0^T + b0 | b1 | ... ) for w < S and
        # just the biases for the cool-down steps (zero-padded x rows).
        xw = jnp.dot(x_ref[...], w_in,
                     preferred_element_type=jnp.float32) + bias_full   # (W*8, LH)

        # Block recurrent matrix (bf16 operands, f32 accumulate on the MXU).
        w_big = p_ref[off_wbig:off_wbig + LH, :].astype(jnp.bfloat16)  # (LH, LH)

        # State: [h_layer0 | ... | h_layer{L-1}], 8 identical rows (row 0 real).
        s = p_ref[off_s0:off_s0 + 8, :]                    # (8, LH) f32

        # Lane index -> layer id, for warm-up masking only.
        lane = jax.lax.broadcasted_iota(jnp.int32, (1, LH), 1)

        last_rows = []
        for w in range(W):                                 # statically unrolled
            pre = xw[w * 8:(w + 1) * 8, :] + jnp.dot(
                s.astype(jnp.bfloat16), w_big,
                preferred_element_type=jnp.float32)        # (8, LH)
            new = jnp.tanh(pre)
            if w < L - 1:
                # Warm-up: layers l > w have not started; keep their h0.
                keep_old = lane >= (w + 1) * H
                s = jnp.where(keep_old, s, new)
            else:
                s = new
            if w >= L - 1:
                # Last layer produced timestep (w - (L-1)); keep batch row 0.
                last_rows.append(new[0:1, :])

        last = jnp.concatenate(last_rows, axis=0)          # (S, LH)

        # Fused Linear head: VPU multiply + lane reduction (w_lin zero outside
        # the last layer's lane block).
        res = jnp.sum(last * w_lin, axis=-1, keepdims=True) + b_lin    # (S, 1)
        if S_pad > S:
            res = jnp.concatenate(
                [res, jnp.zeros((S_pad - S, 1), jnp.float32)], axis=0)

        # Lane-dense, unmasked store of one (S_pad, 128) slab.
        out_ref[...] = jnp.broadcast_to(res, (S_pad, 128))

    return kernel


def rnnet_forward(x, h0, params):
    """Pallas implementation of RNNet.forward.

    x : (S, B, E), h0 : (L, B, H)
    params: dict with per-layer 'w_ih_t' (I,H), 'w_hh_t' (H,H), 'b' (1,H) lists
            plus 'w_lin_t' (H,1) and 'b_lin' (1,1).
    returns (S, 1)
    """
    S, B, E = x.shape
    L = len(params["w_ih_t"])
    H = params["w_hh_t"][0].shape[0]
    LH = L * H
    E_pad = max(8, ((E + 7) // 8) * 8)
    S_pad = ((S + 7) // 8) * 8
    W = S + L - 1

    # ---- only batch row B-1 matters (output[:, -1] on time-major output) ----
    x_b = x[:, B - 1, :]                                   # (S, E)
    if E_pad > E:
        x_b = jnp.pad(x_b, ((0, 0), (0, E_pad - E)))
    # Broadcast each timestep to a full 8-sublane block (aligned per-step slices)
    x_in = jnp.broadcast_to(x_b[:, None, :], (S, 8, E_pad)).reshape(S * 8, E_pad)
    x_in = jnp.pad(x_in, ((0, (W - S) * 8), (0, 0)))       # zero cool-down rows

    # ---- pack every parameter into one 8-row-aligned slab ----
    w_in = jnp.zeros((E_pad, LH), jnp.float32).at[:E, :H].set(params["w_ih_t"][0])

    w_big = jnp.zeros((LH, LH), jnp.float32)
    for l in range(L):
        w_big = w_big.at[l * H:(l + 1) * H, l * H:(l + 1) * H].set(
            params["w_hh_t"][l])
        if l + 1 < L:
            w_big = w_big.at[l * H:(l + 1) * H, (l + 1) * H:(l + 2) * H].set(
                params["w_ih_t"][l + 1])

    bias_full = jnp.concatenate([params["b"][l] for l in range(L)], axis=-1)
    w_lin_full = jnp.zeros((1, LH), jnp.float32).at[:, (L - 1) * H:].set(
        params["w_lin_t"].reshape(1, H))

    misc = jnp.zeros((8, LH), jnp.float32)
    misc = misc.at[0:1, :].set(bias_full)
    misc = misc.at[1:2, :].set(w_lin_full)
    misc = misc.at[2, 0].set(params["b_lin"][0, 0])

    s0_row = jnp.concatenate([h0[l, B - 1, :] for l in range(L)], axis=-1)
    s0 = jnp.broadcast_to(s0_row[None, :], (8, LH))

    packed = jnp.concatenate([w_in, w_big, misc, s0], axis=0)   # (P, LH) f32

    off_wbig = E_pad
    off_misc = E_pad + LH
    off_s0 = off_misc + 8

    kernel = make_fused_kernel(L, S, H, E_pad, S_pad, off_wbig, off_misc, off_s0)

    slab = pl.pallas_call(
        kernel,
        out_shape=jax.ShapeDtypeStruct((S_pad, 128), jnp.float32),
        grid=(),
        in_specs=[
            pl.BlockSpec(x_in.shape, lambda: (0, 0)),
            pl.BlockSpec(packed.shape, lambda: (0, 0)),
        ],
        out_specs=pl.BlockSpec((S_pad, 128), lambda: (0, 0)),
    )(x_in, packed)

    return slab[:S, :1]


# -------------------------- pure-JAX reference check --------------------------

def rnnet_reference(x, h0, params):
    h = x
    for l in range(len(params["w_ih_t"])):
        w_ih_t, w_hh_t, b = params["w_ih_t"][l], params["w_hh_t"][l], params["b"][l]

        def step(h_prev, x_t):
            h_new = jnp.tanh(x_t @ w_ih_t + h_prev @ w_hh_t + b[0])
            return h_new, h_new

        _, ys = jax.lax.scan(step, h0[l], h)
        h = ys
    last = h[:, -1, :]                     # output[:, -1]: last batch element
    return last @ params["w_lin_t"] + params["b_lin"][0]


# ------------------------------------ main -------------------------------------

if __name__ == "__main__":
    # Module hyperparameters (small, consistent with RNNet.__init__)
    embedding_size = 16   # input feature size
    out_size = 32         # RNN hidden size
    num_layers = 2
    p = 0.0               # dropout (inference: identity)
    seq_len = 8
    batch = 4

    key = jax.random.PRNGKey(0)
    keys = jax.random.split(key, 4 * num_layers + 4)

    # PyTorch nn.RNN / nn.Linear init: U(-1/sqrt(H), 1/sqrt(H))
    k_rnn = 1.0 / math.sqrt(out_size)
    params = {"w_ih_t": [], "w_hh_t": [], "b": []}
    for l in range(num_layers):
        in_sz = embedding_size if l == 0 else out_size
        w_ih = jax.random.uniform(keys[4 * l + 0], (out_size, in_sz),
                                  minval=-k_rnn, maxval=k_rnn, dtype=jnp.float32)
        w_hh = jax.random.uniform(keys[4 * l + 1], (out_size, out_size),
                                  minval=-k_rnn, maxval=k_rnn, dtype=jnp.float32)
        b_ih = jax.random.uniform(keys[4 * l + 2], (out_size,),
                                  minval=-k_rnn, maxval=k_rnn, dtype=jnp.float32)
        b_hh = jax.random.uniform(keys[4 * l + 3], (out_size,),
                                  minval=-k_rnn, maxval=k_rnn, dtype=jnp.float32)
        params["w_ih_t"].append(w_ih.T)                         # (I, H)
        params["w_hh_t"].append(w_hh.T)                         # (H, H)
        params["b"].append((b_ih + b_hh).reshape(1, out_size))  # (1, H)

    w_lin = jax.random.uniform(keys[-2], (1, out_size),
                               minval=-k_rnn, maxval=k_rnn, dtype=jnp.float32)
    b_lin = jax.random.uniform(keys[-1], (1,),
                               minval=-k_rnn, maxval=k_rnn, dtype=jnp.float32)
    params["w_lin_t"] = w_lin.T                 # (H, 1)
    params["b_lin"] = b_lin.reshape(1, 1)       # (1, 1)

    # Inputs: x (seq, batch, embedding), h0 (num_layers, batch, out_size)
    kx, kh = jax.random.split(jax.random.PRNGKey(0))
    x = jax.random.normal(kx, (seq_len, batch, embedding_size), dtype=jnp.float32)
    h0 = jax.random.normal(kh, (num_layers, batch, out_size), dtype=jnp.float32)

    fwd = jax.jit(rnnet_forward)
    out = jax.block_until_ready(fwd(x, h0, params))

    ref = jax.block_until_ready(rnnet_reference(x, h0, params))
    assert out.shape == (seq_len, 1), out.shape
    # bf16 operands on the recurrent MXU matmul -> loosen tolerance (see review).
    np.testing.assert_allclose(np.asarray(out), np.asarray(ref),
                               rtol=2e-2, atol=2e-2)
    print("KERNEL_OK")
</pallas_src>

<mosaic_0001>
module attributes {stable_mosaic.version = 11 : i64} {
  func.func @kernel(%arg0: memref<72x16xf32, #tpu.memory_space<vmem>>, %arg1: memref<96x64xf32, #tpu.memory_space<vmem>>, %arg2: memref<8x128xf32, #tpu.memory_space<vmem>>) attributes {dimension_semantics = [], scalar_prefetch = 0 : i64, scratch_operands = 0 : i64, tpu.core_type = #tpu.core_type<tc>} {
    %c0 = arith.constant 0 : index
    %c0_0 = arith.constant 0 : index
    %0 = vector.load %arg1[%c0, %c0_0] : memref<96x64xf32, #tpu.memory_space<vmem>>, vector<16x64xf32>
    %c80 = arith.constant 80 : index
    %c0_1 = arith.constant 0 : index
    %1 = vector.load %arg1[%c80, %c0_1] : memref<96x64xf32, #tpu.memory_space<vmem>>, vector<8x64xf32>
    %2 = vector.extract_strided_slice %1 {offsets = [0, 0], sizes = [1, 64], strides = [1, 1]} : vector<8x64xf32> to vector<1x64xf32>
    %3 = vector.extract_strided_slice %1 {offsets = [1, 0], sizes = [1, 64], strides = [1, 1]} : vector<8x64xf32> to vector<1x64xf32>
    %4 = vector.extract_strided_slice %1 {offsets = [2, 0], sizes = [1, 1], strides = [1, 1]} : vector<8x64xf32> to vector<1x1xf32>
    %c0_2 = arith.constant 0 : index
    %c0_3 = arith.constant 0 : index
    %5 = vector.load %arg0[%c0_2, %c0_3] : memref<72x16xf32, #tpu.memory_space<vmem>>, vector<72x16xf32>
    %cst = arith.constant dense<0.000000e+00> : vector<72x64xf32>
    %6 = tpu.matmul %5, %0, %cst {dimension_numbers = #tpu.dot_dimension_numbers<[1], [0], [0], [1], [0, 0, 1, 1], [], []>} : vector<72x16xf32>, vector<16x64xf32>, vector<72x64xf32> -> vector<72x64xf32>
    %7 = vector.broadcast %2 : vector<1x64xf32> to vector<72x64xf32>
    %8 = arith.addf %6, %7 : vector<72x64xf32>
    %c16 = arith.constant 16 : index
    %c0_4 = arith.constant 0 : index
    %9 = vector.load %arg1[%c16, %c0_4] : memref<96x64xf32, #tpu.memory_space<vmem>>, vector<64x64xf32>
    %10 = arith.truncf %9 : vector<64x64xf32> to vector<64x64xbf16>
    %c88 = arith.constant 88 : index
    %c0_5 = arith.constant 0 : index
    %11 = vector.load %arg1[%c88, %c0_5] : memref<96x64xf32, #tpu.memory_space<vmem>>, vector<8x64xf32>
    %12 = tpu.iota {dimensions = array<i32: 1>} : vector<1x64xi32>
    %13 = vector.extract_strided_slice %8 {offsets = [0, 0], sizes = [8, 64], strides = [1, 1]} : vector<72x64xf32> to vector<8x64xf32>
    %14 = arith.truncf %11 : vector<8x64xf32> to vector<8x64xbf16>
    %cst_6 = arith.constant dense<0.000000e+00> : vector<8x64xf32>
    %15 = tpu.matmul %14, %10, %cst_6 {dimension_numbers = #tpu.dot_dimension_numbers<[1], [0], [0], [1], [0, 0, 1, 1], [], []>} : vector<8x64xbf16>, vector<64x64xbf16>, vector<8x64xf32> -> vector<8x64xf32>
    %16 = arith.addf %13, %15 : vector<8x64xf32>
    %17 = math.tanh %16 : vector<8x64xf32>
    %c32_i32 = arith.constant 32 : i32
    %18 = vector.broadcast %c32_i32 : i32 to vector<1x64xi32>
    %19 = arith.cmpi sge, %12, %18 : vector<1x64xi32>
    %20 = vector.shape_cast %19 : vector<1x64xi1> to vector<1x64xi1>
    %21 = vector.broadcast %20 : vector<1x64xi1> to vector<8x64xi1>
    %22 = arith.select %21, %11, %17 : vector<8x64xi1>, vector<8x64xf32>
    %23 = vector.extract_strided_slice %8 {offsets = [8, 0], sizes = [8, 64], strides = [1, 1]} : vector<72x64xf32> to vector<8x64xf32>
    %24 = arith.truncf %22 : vector<8x64xf32> to vector<8x64xbf16>
    %cst_7 = arith.constant dense<0.000000e+00> : vector<8x64xf32>
    %25 = tpu.matmul %24, %10, %cst_7 {dimension_numbers = #tpu.dot_dimension_numbers<[1], [0], [0], [1], [0, 0, 1, 1], [], []>} : vector<8x64xbf16>, vector<64x64xbf16>, vector<8x64xf32> -> vector<8x64xf32>
    %26 = arith.addf %23, %25 : vector<8x64xf32>
    %27 = math.tanh %26 : vector<8x64xf32>
    %28 = vector.extract_strided_slice %27 {offsets = [0, 0], sizes = [1, 64], strides = [1, 1]} : vector<8x64xf32> to vector<1x64xf32>
    %29 = vector.extract_strided_slice %8 {offsets = [16, 0], sizes = [8, 64], strides = [1, 1]} : vector<72x64xf32> to vector<8x64xf32>
    %30 = arith.truncf %27 : vector<8x64xf32> to vector<8x64xbf16>
    %cst_8 = arith.constant dense<0.000000e+00> : vector<8x64xf32>
    %31 = tpu.matmul %30, %10, %cst_8 {dimension_numbers = #tpu.dot_dimension_numbers<[1], [0], [0], [1], [0, 0, 1, 1], [], []>} : vector<8x64xbf16>, vector<64x64xbf16>, vector<8x64xf32> -> vector<8x64xf32>
    %32 = arith.addf %29, %31 : vector<8x64xf32>
    %33 = math.tanh %32 : vector<8x64xf32>
    %34 = vector.extract_strided_slice %33 {offsets = [0, 0], sizes = [1, 64], strides = [1, 1]} : vector<8x64xf32> to vector<1x64xf32>
    %35 = vector.extract_strided_slice %8 {offsets = [24, 0], sizes = [8, 64], strides = [1, 1]} : vector<72x64xf32> to vector<8x64xf32>
    %36 = arith.truncf %33 : vector<8x64xf32> to vector<8x64xbf16>
    %cst_9 = arith.constant dense<0.000000e+00> : vector<8x64xf32>
    %37 = tpu.matmul %36, %10, %cst_9 {dimension_numbers = #tpu.dot_dimension_numbers<[1], [0], [0], [1], [0, 0, 1, 1], [], []>} : vector<8x64xbf16>, vector<64x64xbf16>, vector<8x64xf32> -> vector<8x64xf32>
    %38 = arith.addf %35, %37 : vector<8x64xf32>
    %39 = math.tanh %38 : vector<8x64xf32>
    %40 = vector.extract_strided_slice %39 {offsets = [0, 0], sizes = [1, 64], strides = [1, 1]} : vector<8x64xf32> to vector<1x64xf32>
    %41 = vector.extract_strided_slice %8 {offsets = [32, 0], sizes = [8, 64], strides = [1, 1]} : vector<72x64xf32> to vector<8x64xf32>
    %42 = arith.truncf %39 : vector<8x64xf32> to vector<8x64xbf16>
    %cst_10 = arith.constant dense<0.000000e+00> : vector<8x64xf32>
    %43 = tpu.matmul %42, %10, %cst_10 {dimension_numbers = #tpu.dot_dimension_numbers<[1], [0], [0], [1], [0, 0, 1, 1], [], []>} : vector<8x64xbf16>, vector<64x64xbf16>, vector<8x64xf32> -> vector<8x64xf32>
    %44 = arith.addf %41, %43 : vector<8x64xf32>
    %45 = math.tanh %44 : vector<8x64xf32>
    %46 = vector.extract_strided_slice %45 {offsets = [0, 0], sizes = [1, 64], strides = [1, 1]} : vector<8x64xf32> to vector<1x64xf32>
    %47 = vector.extract_strided_slice %8 {offsets = [40, 0], sizes = [8, 64], strides = [1, 1]} : vector<72x64xf32> to vector<8x64xf32>
    %48 = arith.truncf %45 : vector<8x64xf32> to vector<8x64xbf16>
    %cst_11 = arith.constant dense<0.000000e+00> : vector<8x64xf32>
    %49 = tpu.matmul %48, %10, %cst_11 {dimension_numbers = #tpu.dot_dimension_numbers<[1], [0], [0], [1], [0, 0, 1, 1], [], []>} : vector<8x64xbf16>, vector<64x64xbf16>, vector<8x64xf32> -> vector<8x64xf32>
    %50 = arith.addf %47, %49 : vector<8x64xf32>
    %51 = math.tanh %50 : vector<8x64xf32>
    %52 = vector.extract_strided_slice %51 {offsets = [0, 0], sizes = [1, 64], strides = [1, 1]} : vector<8x64xf32> to vector<1x64xf32>
    %53 = vector.extract_strided_slice %8 {offsets = [48, 0], sizes = [8, 64], strides = [1, 1]} : vector<72x64xf32> to vector<8x64xf32>
    %54 = arith.truncf %51 : vector<8x64xf32> to vector<8x64xbf16>
    %cst_12 = arith.constant dense<0.000000e+00> : vector<8x64xf32>
    %55 = tpu.matmul %54, %10, %cst_12 {dimension_numbers = #tpu.dot_dimension_numbers<[1], [0], [0], [1], [0, 0, 1, 1], [], []>} : vector<8x64xbf16>, vector<64x64xbf16>, vector<8x64xf32> -> vector<8x64xf32>
    %56 = arith.addf %53, %55 : vector<8x64xf32>
    %57 = math.tanh %56 : vector<8x64xf32>
    %58 = vector.extract_strided_slice %57 {offsets = [0, 0], sizes = [1, 64], strides = [1, 1]} : vector<8x64xf32> to vector<1x64xf32>
    %59 = vector.extract_strided_slice %8 {offsets = [56, 0], sizes = [8, 64], strides = [1, 1]} : vector<72x64xf32> to vector<8x64xf32>
    %60 = arith.truncf %57 : vector<8x64xf32> to vector<8x64xbf16>
    %cst_13 = arith.constant dense<0.000000e+00> : vector<8x64xf32>
    %61 = tpu.matmul %60, %10, %cst_13 {dimension_numbers = #tpu.dot_dimension_numbers<[1], [0], [0], [1], [0, 0, 1, 1], [], []>} : vector<8x64xbf16>, vector<64x64xbf16>, vector<8x64xf32> -> vector<8x64xf32>
    %62 = arith.addf %59, %61 : vector<8x64xf32>
    %63 = math.tanh %62 : vector<8x64xf32>
    %64 = vector.extract_strided_slice %63 {offsets = [0, 0], sizes = [1, 64], strides = [1, 1]} : vector<8x64xf32> to vector<1x64xf32>
    %65 = vector.extract_strided_slice %8 {offsets = [64, 0], sizes = [8, 64], strides = [1, 1]} : vector<72x64xf32> to vector<8x64xf32>
    %66 = arith.truncf %63 : vector<8x64xf32> to vector<8x64xbf16>
    %cst_14 = arith.constant dense<0.000000e+00> : vector<8x64xf32>
    %67 = tpu.matmul %66, %10, %cst_14 {dimension_numbers = #tpu.dot_dimension_numbers<[1], [0], [0], [1], [0, 0, 1, 1], [], []>} : vector<8x64xbf16>, vector<64x64xbf16>, vector<8x64xf32> -> vector<8x64xf32>
    %68 = arith.addf %65, %67 : vector<8x64xf32>
    %69 = math.tanh %68 : vector<8x64xf32>
    %70 = vector.extract_strided_slice %69 {offsets = [0, 0], sizes = [1, 64], strides = [1, 1]} : vector<8x64xf32> to vector<1x64xf32>
    %71 = tpu.concatenate %28, %34, %40, %46, %52, %58, %64, %70 in 0 : vector<1x64xf32>, vector<1x64xf32>, vector<1x64xf32>, vector<1x64xf32>, vector<1x64xf32>, vector<1x64xf32>, vector<1x64xf32>, vector<1x64xf32> -> vector<8x64xf32>
    %72 = vector.broadcast %3 : vector<1x64xf32> to vector<8x64xf32>
    %73 = arith.mulf %71, %72 : vector<8x64xf32>
    %cst_15 = arith.constant dense<0.000000e+00> : vector<8xf32>
    %74 = vector.multi_reduction <add>, %73, %cst_15 [1] : vector<8x64xf32> to vector<8xf32>
    %75 = vector.shape_cast %74 : vector<8xf32> to vector<8x1xf32>
    %76 = vector.broadcast %4 : vector<1x1xf32> to vector<8x1xf32>
    %77 = arith.addf %75, %76 : vector<8x1xf32>
    %78 = vector.shape_cast %77 : vector<8x1xf32> to vector<8x1xf32>
    %79 = vector.broadcast %78 : vector<8x1xf32> to vector<8x128xf32>
    %c0_16 = arith.constant 0 : index
    %c0_17 = arith.constant 0 : index
    %80 = vector.load %arg2[%c0_16, %c0_17] : memref<8x128xf32, #tpu.memory_space<vmem>>, vector<8x128xf32>
    tpu.vector_store %arg2[%c0_16, %c0_17], %79 {strides = array<i32>} : memref<8x128xf32, #tpu.memory_space<vmem>>, vector<8x128xf32>,
    return
  }
}

</mosaic_0001>

<bundles_post_ra>
// kernel: rnnet_forward.1
= control target key start
LH: loop header
LB: loop body
LE: loop exit
PB: predicated region body
PF: predicated region fallthrough
CT: control target
= control target key end

     0   :  { %v897_v0 = vmov 0.0   ;;  %v898_v4 = vmov 0.0|0.0   ;;  %vm899_vm0 = vmmov 0   ;;  %vm28_vm1 = vcmask 130048   ;;  %s1153_s1 = inlined_call_operand.vmem [shape: f32[96,64], index: 1, kind: input, shape index: {}]   ;;  %s1154_s0 = inlined_call_operand.vmem [shape: f32[72,16], index: 0, kind: input, shape index: {}]   ;;  %s1155_s2 = inlined_call_operand.vmem [shape: f32[8,128], index: 2, kind: output, shape index: {}]  }
   0x1   :  { %763 = vmatprep.subr.bf16.mxu1 %v897_v0  ;;  %v166_v1 = vld [vmem:[%s1153_s1 + $0x10] sm:$0xff]  ;;  %v167_v2 = vld [vmem:[%s1153_s1 + $0x18] sm:$0xff]  ;;  %v168_v3 = vld [vmem:[%s1153_s1 + $0x20] sm:$0xff]  ;;  %871 = vmatprep.subr.bf16.mxu0 %v898_v4  ;;  %vm182_vm2 = vcmask 523264   ;;  %v24_v25 = vlaneseq  ;;  %vm621_vm4 = vcmask 1040384   ;;  %vm623_vm5 = vcmask 1041408  }
   0x2   :  { %v926_v5 = vpack.c.bf16 %v167_v2, %v166_v1  ;;  %v169_v6 = vld [vmem:[%s1153_s1 + $0x28] sm:$0xff]  ;;  %736 = vmatprep.mubr.msk.f32.mxu0 %vm899_vm0, %v897_v0  ;;  %771 = vmatprep.mubr.msk.bf16.mxu1 %vm899_vm0, %v897_v0  ;;  %v12_v7 = vld [vmem:[%s1153_s1] sm:$0xff]  ;;  %v170_v11 = vld [vmem:[%s1153_s1 + $0x30] sm:$0xff]  ;;  %vm625_vm6 = vcmask 1042432   ;;  %vm627_vm7 = vcmask 1043456   ;;  %vm629_vm8 = vcmask 1044480  }
   0x3   :  { %v13_v8 = vld [vmem:[%s1153_s1 + $0x8] sm:$0xff]  ;;  %v942_v9 = vpack.c.bf16 %v169_v6, %v168_v3  ;;  %v171_v12 = vld [vmem:[%s1153_s1 + $0x38] sm:$0xff]  ;;  %v15_v13 = vld [vmem:[%s1154_s0] sm:$0xff]  ;;  %v1026_v26 = vshrl.u32 %v24_v25, 7  ;;  %v180_v38 = vand.u32 127, %v24_v25  ;;  %vm631_vm9 = vcmask 1045504  }
   0x4   :  { %764 = vmatpush3.bf16.msra.mxu1 %v926_v5  ;;  %v872_v10 = vpack.c.bf16 %v13_v8, %v12_v7  ;;  %v956_v14 = vpack.c.bf16 %v171_v12, %v170_v11  ;;  %v172_v15 = vld [vmem:[%s1153_s1 + $0x40] sm:$0xff]  ;;  %v173_v16 = vld [vmem:[%s1153_s1 + $0x48] sm:$0xff]  ;;  %v178_v18 = vld [vmem:[%s1153_s1 + $0x58] sm:$0xff]  ;;  %vm633_vm10 = vcmask 1046528  }
   0x5   :  { %765 = vmatprep.subr.bf16.mxu1 %v897_v0  ;;  %v971_v17 = vpack.c.bf16 %v173_v16, %v172_v15  ;;  %v181_v19 = vpack.c.bf16 %v178_v18, %v178_v18  ;;  %v16_v20 = vld [vmem:[%s1154_s0 + $0x8] sm:$0xff]  ;;  %v17_v21 = vld [vmem:[%s1154_s0 + $0x10] sm:$0xff]  ;;  %v18_v22 = vld [vmem:[%s1154_s0 + $0x18] sm:$0xff]  ;;  %v26_v27 = vsub.s32 0, %v1026_v26  ;;  %vm228_vm3 = vcmp.ge.s32.totalorder %v180_v38, 32 }
   0x6   :  { %873 = vmatpush3.bf16.msra.mxu0 %v872_v10  ;;  %v19_v23 = vld [vmem:[%s1154_s0 + $0x20] sm:$0xff]  ;;  %v20_v24 = vld [vmem:[%s1154_s0 + $0x28] sm:$0xff]  ;;  %v1032_v28 = vld [vmem:[%s1153_s1 + $0x50] sm:$0xff] }
   0x7   :  { %787 = vmatprep.subr.bf16.mxu0 %v897_v0  ;;  %v1035_v31 = vrot.slane %v1032_v28, %v26_v27  ;;  %v21_v44 = vld [vmem:[%s1154_s0 + $0x30] sm:$0xff]  ;;  %v22_v45 = vld [vmem:[%s1154_s0 + $0x38] sm:$0xff]  ;;  %v23_v46 = vld [vmem:[%s1154_s0 + $0x40] sm:$0xff] }
   0x8   :  { %766 = vmatpush3.bf16.msra.mxu1 %v942_v9 }
   0x9   :  { %767 = vmatprep.subr.bf16.mxu1 %v897_v0  ;;  %737 = vmatmul.mubr.msk.f32.vlgmr.msra.gmra.mrb[0].mxu0 %vm28_vm1, %v15_v13 }
   0xa   :  { %739 = vmatprep.mubr.msk.f32.mxu0 %vm899_vm0, %v897_v0  ;;  %788 = vmatpush3.bf16.msra.mxu0 %v926_v5 }
   0xb   :  { %789 = vmatprep.subr.bf16.mxu0 %v897_v0 }
   0xc   :  { %768 = vmatpush3.bf16.msra.mxu1 %v956_v14 }
   0xd   :  { %769 = vmatprep.subr.bf16.mxu1 %v897_v0  ;;  %740 = vmatmul.mubr.msk.f32.gmra.mrb[2].mxu0 %vm28_vm1, %v16_v20 }
   0xe   :  { %790 = vmatpush3.bf16.msra.mxu0 %v942_v9  ;;  %742 = vmatprep.mubr.msk.f32.mxu0 %vm899_vm0, %v897_v0 }
   0xf   :  { %791 = vmatprep.subr.bf16.mxu0 %v897_v0 }
  0x10   :  { %770 = vmatpush3.bf16.msra.mxu1 %v971_v17 }
  0x11   :  { %775 = vmatprep.subr.bf16.mxu1 %v897_v0  ;;  %743 = vmatmul.mubr.msk.f32.gmra.mrb[4].mxu0 %vm28_vm1, %v17_v21 }
  0x12   :  { %792 = vmatpush3.bf16.msra.mxu0 %v956_v14  ;;  %745 = vmatprep.mubr.msk.f32.mxu0 %vm899_vm0, %v897_v0 }
  0x13   :  { %772 = vmatmul.mubr.msk.bf16.vlgmr.msra.gmra.mrb[0].mxu1 %vm182_vm2, %v181_v19  ;;  %793 = vmatprep.subr.bf16.mxu0 %v897_v0 }
  0x14   :  { %776 = vmatpush3.bf16.msra.mxu1 %v926_v5  ;;  %783 = vmatprep.mubr.msk.bf16.mxu1 %vm899_vm0, %v897_v0 }
  0x15   :  { %777 = vmatprep.subr.bf16.mxu1 %v897_v0  ;;  %746 = vmatmul.mubr.msk.f32.gmra.mrb[6].mxu0 %vm28_vm1, %v18_v22 }
  0x16   :  { %794 = vmatpush3.bf16.msra.mxu0 %v971_v17  ;;  %748 = vmatprep.mubr.msk.f32.mxu0 %vm899_vm0, %v897_v0 }
  0x17   :  { %811 = vmatprep.subr.bf16.mxu0 %v897_v0 }
  0x18   :  { %778 = vmatpush3.bf16.msra.mxu1 %v942_v9 }
  0x19   :  { %779 = vmatprep.subr.bf16.mxu1 %v897_v0  ;;  %749 = vmatmul.mubr.msk.f32.gmra.mrb[8].mxu0 %vm28_vm1, %v19_v23 }
  0x1a   :  { %751 = vmatprep.mubr.msk.f32.mxu0 %vm899_vm0, %v897_v0 }
  0x1c   :  { %780 = vmatpush3.bf16.msra.mxu1 %v956_v14 }
  0x1d   :  { %781 = vmatprep.subr.bf16.mxu1 %v897_v0  ;;  %752 = vmatmul.mubr.msk.f32.gmra.mrb[10].mxu0 %vm28_vm1, %v20_v24 }
  0x1e   :  { %754 = vmatprep.mubr.msk.f32.mxu0 %vm899_vm0, %v897_v0 }
  0x20   :  { %782 = vmatpush3.bf16.msra.mxu1 %v971_v17 }
  0x21   :  { %799 = vmatprep.subr.bf16.mxu1 %v897_v0  ;;  %755 = vmatmul.mubr.msk.f32.gmra.mrb[12].mxu0 %vm28_vm1, %v21_v44 }
  0x22   :  { %757 = vmatprep.mubr.msk.f32.mxu0 %vm899_vm0, %v897_v0 }
  0x25   :  { %758 = vmatmul.mubr.msk.f32.gmra.mrb[14].mxu0 %vm28_vm1, %v22_v45 }
  0x26   :  { %760 = vmatprep.mubr.msk.f32.mxu0 %vm899_vm0, %v897_v0 }
  0x29   :  { %761 = vmatmul.mubr.msk.f32.gmra.mrb[16].mxu0 %vm28_vm1, %v23_v46 }
  0x2a   :  { %795 = vmatprep.mubr.msk.bf16.mxu0 %vm899_vm0, %v897_v0 }
  0xdc   :  { %v122_v29 = vpop.f32.mrb[0].mxu0 }
  0xdd   :  { %v738_v30 = vpop.f32.mrb[1].mxu0  ;;  %v123_v32 = vadd.f32 %v122_v29, %v1035_v31 }
  0xe0   :  { %v127_v42 = vpop.f32.mrb[2].mxu0 }
  0xe1   :  { %v741_v43 = vpop.f32.mrb[3].mxu0  ;;  %v128_v55 = vadd.f32 %v127_v42, %v1035_v31 }
  0xe4   :  { %v132_v47 = vpop.f32.mrb[4].mxu0 }
  0xe5   :  { %v744_v48 = vpop.f32.mrb[5].mxu0  ;;  %v133_v7 = vadd.f32 %v132_v47, %v1035_v31 }
  0xe6   :  { %v220_v33 = vpop.f32.mrb[0].mxu1 }
  0xe7   :  { %v226_v34 = vadd.f32 %v220_v33, %v123_v32  ;;  %v773_v35 = vpop.f32.mrb[1].mxu1 }
  0xe8   :  { %v223_v36 = vpop.f32.mrb[2].mxu1  ;;  %v137_v49 = vpop.f32.mrb[6].mxu0 }
  0xe9   :  { %879 = vtanh.f32 %v226_v34  ;;  %v774_v37 = vpop.f32.mrb[3].mxu1  ;;  %v747_v50 = vpop.f32.mrb[7].mxu0 }
  0xec   :  { %v1067_v51 = vpop.f32.mrb[8].mxu0 }
  0xed   :  { %v750_v52 = vpop.f32.mrb[9].mxu0  ;;  %v143_v33 = vadd.f32 %v1067_v51, %v1035_v31 }
  0xf0   :  { %v1069_v53 = vpop.f32.mrb[10].mxu0 }
  0xf1   :  { %v753_v54 = vpop.f32.mrb[11].mxu0  ;;  %v148_v43 = vadd.f32 %v1069_v53, %v1035_v31 }
  0xf3   :  { %v880_v39 = vpop.eup %879 }
  0xf4   :  { %v231_v40 = vsel %vm228_vm3, %v178_v18, %v880_v39  ;;  %v1083_v63 = vpop.f32.mrb[12].mxu0  ;;  %v138_v18 = vadd.f32 %v137_v49, %v1035_v31 }
  0xf5   :  { %v232_v41 = vpack.c.bf16 %v231_v40, %v231_v40  ;;  %v756_v1 = vpop.f32.mrb[13].mxu0  ;;  %v153_v53 = vadd.f32 %v1083_v63, %v1035_v31 }
  0xf7   :  { %784 = vmatmul.mubr.msk.bf16.vlgmr.msra.gmra.mrb[4].mxu1 %vm182_vm2, %v232_v41 }
  0xf8   :  { %800 = vmatpush3.bf16.msra.mxu1 %v926_v5  ;;  %807 = vmatprep.mubr.msk.bf16.mxu1 %vm899_vm0, %v897_v0  ;;  %v1085_v2 = vpop.f32.mrb[14].mxu0 }
  0xf9   :  { %801 = vmatprep.subr.bf16.mxu1 %v897_v0  ;;  %v759_v3 = vpop.f32.mrb[15].mxu0 }
  0xfc   :  { %802 = vmatpush3.bf16.msra.mxu1 %v942_v9  ;;  %v1087_v4 = vpop.f32.mrb[16].mxu0 }
  0xfd   :  { %803 = vmatprep.subr.bf16.mxu1 %v897_v0  ;;  %v762_v6 = vpop.f32.mrb[17].mxu0 }
 0x100   :  { %804 = vmatpush3.bf16.msra.mxu1 %v956_v14 }
 0x101   :  { %805 = vmatprep.subr.bf16.mxu1 %v897_v0 }
 0x104   :  { %806 = vmatpush3.bf16.msra.mxu1 %v971_v17 }
 0x105   :  { %823 = vmatprep.subr.bf16.mxu1 %v897_v0 }
 0x1ca   :  { %v270_v56 = vpop.f32.mrb[4].mxu1 }
 0x1cb   :  { %v276_v57 = vadd.f32 %v270_v56, %v128_v55  ;;  %v785_v58 = vpop.f32.mrb[5].mxu1 }
 0x1cc   :  { %v273_v59 = vpop.f32.mrb[6].mxu1 }
 0x1cd   :  { %881 = vtanh.f32 %v276_v57  ;;  %v786_v60 = vpop.f32.mrb[7].mxu1 }
 0x1d7   :  { %v882_v61 = vpop.eup %881 }
 0x1d8   :  { %v278_v62 = vpack.c.bf16 %v882_v61, %v882_v61 }
 0x1da   :  { %796 = vmatmul.mubr.msk.bf16.vlgmr.msra.gmra.mrb[20].mxu0 %vm182_vm2, %v278_v62 }
 0x1db   :  { %812 = vmatpush3.bf16.msra.mxu0 %v926_v5  ;;  %819 = vmatprep.mubr.msk.bf16.mxu0 %vm899_vm0, %v897_v0 }
 0x1dc   :  { %813 = vmatprep.subr.bf16.mxu0 %v897_v0 }
 0x1df   :  { %814 = vmatpush3.bf16.msra.mxu0 %v942_v9 }
 0x1e0   :  { %815 = vmatprep.subr.bf16.mxu0 %v897_v0 }
 0x1e3   :  { %816 = vmatpush3.bf16.msra.mxu0 %v956_v14 }
 0x1e4   :  { %817 = vmatprep.subr.bf16.mxu0 %v897_v0 }
 0x1e7   :  { %818 = vmatpush3.bf16.msra.mxu0 %v971_v17 }
 0x1e8   :  { %835 = vmatprep.subr.bf16.mxu0 %v897_v0 }
 0x2ad   :  { %v316_v8 = vpop.f32.mrb[20].mxu0 }
 0x2ae   :  { %v322_v10 = vadd.f32 %v316_v8, %v133_v7  ;;  %v797_v11 = vpop.f32.mrb[21].mxu0  ;;  %v163_v8 = vadd.f32 %v1087_v4, %v1035_v31 }
 0x2af   :  { %v319_v12 = vpop.f32.mrb[22].mxu0 }
 0x2b0   :  { %883 = vtanh.f32 %v322_v10  ;;  %v798_v13 = vpop.f32.mrb[23].mxu0 }
 0x2ba   :  { %v884_v15 = vpop.eup %883 }
 0x2bb   :  { %v324_v16 = vpack.c.bf16 %v884_v15, %v884_v15  ;;  %v601_v24 = vrot.slane %v884_v15, 7  ;;  %v637_v15 = vsub.s32 1, %v1026_v26 }
 0x2bd   :  { %808 = vmatmul.mubr.msk.bf16.vlgmr.msra.gmra.mrb[8].mxu1 %vm182_vm2, %v324_v16  ;;  %v622_v30 = vsel %vm621_vm4, %v882_v61, %v601_v24 }
 0x2be   :  { %824 = vmatpush3.bf16.msra.mxu1 %v926_v5  ;;  %831 = vmatprep.mubr.msk.bf16.mxu1 %vm899_vm0, %v897_v0 }
 0x2bf   :  { %825 = vmatprep.subr.bf16.mxu1 %v897_v0 }
 0x2c2   :  { %826 = vmatpush3.bf16.msra.mxu1 %v942_v9 }
 0x2c3   :  { %827 = vmatprep.subr.bf16.mxu1 %v897_v0 }
 0x2c6   :  { %828 = vmatpush3.bf16.msra.mxu1 %v956_v14 }
 0x2c7   :  { %829 = vmatprep.subr.bf16.mxu1 %v897_v0 }
 0x2ca   :  { %830 = vmatpush3.bf16.msra.mxu1 %v971_v17 }
 0x2cb   :  { %847 = vmatprep.subr.bf16.mxu1 %v897_v0 }
 0x390   :  { %v362_v19 = vpop.f32.mrb[8].mxu1 }
 0x391   :  { %v368_v20 = vadd.f32 %v362_v19, %v138_v18  ;;  %v809_v21 = vpop.f32.mrb[9].mxu1  ;;  %v638_v18 = vrot.slane %v1032_v28, %v637_v15 }
 0x392   :  { %v365_v22 = vpop.f32.mrb[10].mxu1 }
 0x393   :  { %885 = vtanh.f32 %v368_v20  ;;  %v810_v23 = vpop.f32.mrb[11].mxu1 }
 0x394   :  { %v900_v23 = vmov 0  }
 0x395   :  { %878 = vset.pattern.permute.xlu0 %v900_v23 }
 0x39d   :  { %v886_v25 = vpop.eup %885 }
 0x39e   :  { %v604_v27 = vrot.slane %v886_v25, 6  ;;  %v370_v29 = vpack.c.bf16 %v886_v25, %v886_v25 }
 0x3a0   :  { %820 = vmatmul.mubr.msk.bf16.vlgmr.msra.gmra.mrb[24].mxu0 %vm182_vm2, %v370_v29  ;;  %v624_v32 = vsel %vm623_vm5, %v622_v30, %v604_v27 }
 0x3a1   :  { %836 = vmatpush3.bf16.msra.mxu0 %v926_v5  ;;  %843 = vmatprep.mubr.msk.bf16.mxu0 %vm899_vm0, %v897_v0 }
 0x3a2   :  { %837 = vmatprep.subr.bf16.mxu0 %v897_v0 }
 0x3a5   :  { %838 = vmatpush3.bf16.msra.mxu0 %v942_v9 }
 0x3a6   :  { %839 = vmatprep.subr.bf16.mxu0 %v897_v0 }
 0x3a9   :  { %840 = vmatpush3.bf16.msra.mxu0 %v956_v14 }
 0x3aa   :  { %841 = vmatprep.subr.bf16.mxu0 %v897_v0 }
 0x3ad   :  { %842 = vmatpush3.bf16.msra.mxu0 %v971_v17 }
 0x3ae   :  { %859 = vmatprep.subr.bf16.mxu0 %v897_v0 }
 0x473   :  { %v408_v34 = vpop.f32.mrb[24].mxu0 }
 0x474   :  { %v414_v35 = vadd.f32 %v408_v34, %v143_v33  ;;  %v821_v36 = vpop.f32.mrb[25].mxu0 }
 0x475   :  { %v411_v37 = vpop.f32.mrb[26].mxu0 }
 0x476   :  { %887 = vtanh.f32 %v414_v35  ;;  %v822_v38 = vpop.f32.mrb[27].mxu0 }
 0x480   :  { %v888_v39 = vpop.eup %887 }
 0x481   :  { %v607_v40 = vrot.slane %v888_v39, 5  ;;  %v416_v41 = vpack.c.bf16 %v888_v39, %v888_v39 }
 0x483   :  { %832 = vmatmul.mubr.msk.bf16.vlgmr.msra.gmra.mrb[12].mxu1 %vm182_vm2, %v416_v41  ;;  %v626_v42 = vsel %vm625_vm6, %v624_v32, %v607_v40 }
 0x484   :  { %848 = vmatpush3.bf16.msra.mxu1 %v926_v5  ;;  %855 = vmatprep.mubr.msk.bf16.mxu1 %vm899_vm0, %v897_v0 }
 0x485   :  { %849 = vmatprep.subr.bf16.mxu1 %v897_v0 }
 0x488   :  { %850 = vmatpush3.bf16.msra.mxu1 %v942_v9 }
 0x489   :  { %851 = vmatprep.subr.bf16.mxu1 %v897_v0 }
 0x48c   :  { %852 = vmatpush3.bf16.msra.mxu1 %v956_v14 }
 0x48d   :  { %853 = vmatprep.subr.bf16.mxu1 %v897_v0 }
 0x490   :  { %854 = vmatpush3.bf16.msra.mxu1 %v971_v17 }
 0x556   :  { %v454_v44 = vpop.f32.mrb[12].mxu1 }
 0x557   :  { %v460_v45 = vadd.f32 %v454_v44, %v148_v43  ;;  %v833_v46 = vpop.f32.mrb[13].mxu1 }
 0x558   :  { %v457_v47 = vpop.f32.mrb[14].mxu1 }
 0x559   :  { %889 = vtanh.f32 %v460_v45  ;;  %v834_v48 = vpop.f32.mrb[15].mxu1 }
 0x563   :  { %v890_v49 = vpop.eup %889 }
 0x564   :  { %v610_v50 = vrot.slane %v890_v49, 4  ;;  %v462_v51 = vpack.c.bf16 %v890_v49, %v890_v49 }
 0x566   :  { %844 = vmatmul.mubr.msk.bf16.vlgmr.msra.gmra.mrb[28].mxu0 %vm182_vm2, %v462_v51  ;;  %v628_v52 = vsel %vm627_vm7, %v626_v42, %v610_v50 }
 0x567   :  { %860 = vmatpush3.bf16.msra.mxu0 %v926_v5  ;;  %867 = vmatprep.mubr.msk.bf16.mxu0 %vm899_vm0, %v897_v0 }
 0x568   :  { %861 = vmatprep.subr.bf16.mxu0 %v897_v0 }
 0x56b   :  { %862 = vmatpush3.bf16.msra.mxu0 %v942_v9 }
 0x56c   :  { %863 = vmatprep.subr.bf16.mxu0 %v897_v0 }
 0x56f   :  { %864 = vmatpush3.bf16.msra.mxu0 %v956_v14 }
 0x570   :  { %865 = vmatprep.subr.bf16.mxu0 %v897_v0  ;;  %v158_v0 = vadd.f32 %v1085_v2, %v1035_v31  ;;  %v645_v31 = vsub.s32 2, %v1026_v26 }
 0x572   :  { %v646_v4 = vrot.slane %v1032_v28, %v645_v31 }
 0x573   :  { %866 = vmatpush3.bf16.msra.mxu0 %v971_v17 }
 0x639   :  { %v500_v54 = vpop.f32.mrb[28].mxu0 }
 0x63a   :  { %v506_v5 = vadd.f32 %v500_v54, %v153_v53  ;;  %v845_v55 = vpop.f32.mrb[29].mxu0 }
 0x63b   :  { %v503_v56 = vpop.f32.mrb[30].mxu0 }
 0x63c   :  { %891 = vtanh.f32 %v506_v5  ;;  %v846_v57 = vpop.f32.mrb[31].mxu0 }
 0x646   :  { %v892_v58 = vpop.eup %891 }
 0x647   :  { %v508_v9 = vpack.c.bf16 %v892_v58, %v892_v58  ;;  %v613_v59 = vrot.slane %v892_v58, 3 }
 0x649   :  { %856 = vmatmul.mubr.msk.bf16.vlgmr.msra.gmra.mrb[16].mxu1 %vm182_vm2, %v508_v9  ;;  %v630_v14 = vsel %vm629_vm8, %v628_v52, %v613_v59 }
 0x71c   :  { %v546_v17 = vpop.f32.mrb[16].mxu1 }
 0x71d   :  { %v552_v60 = vadd.f32 %v546_v17, %v158_v0  ;;  %v857_v61 = vpop.f32.mrb[17].mxu1 }
 0x71e   :  { %v549_v62 = vpop.f32.mrb[18].mxu1 }
 0x71f   :  { %893 = vtanh.f32 %v552_v60  ;;  %v858_v63 = vpop.f32.mrb[19].mxu1 }
 0x729   :  { %v894_v1 = vpop.eup %893 }
 0x72a   :  { %v554_v3 = vpack.c.bf16 %v894_v1, %v894_v1  ;;  %v616_v6 = vrot.slane %v894_v1, 2 }
 0x72c   :  { %868 = vmatmul.mubr.msk.bf16.vlgmr.msra.gmra.mrb[32].mxu0 %vm182_vm2, %v554_v3  ;;  %v632_v7 = vsel %vm631_vm9, %v630_v14, %v616_v6 }
 0x7ff   :  { %v592_v10 = vpop.f32.mrb[32].mxu0 }
 0x800   :  { %v598_v11 = vadd.f32 %v592_v10, %v163_v8  ;;  %v869_v12 = vpop.f32.mrb[33].mxu0 }
 0x801   :  { %v595_v2 = vpop.f32.mrb[34].mxu0 }
 0x802   :  { %895 = vtanh.f32 %v598_v11  ;;  %v870_v13 = vpop.f32.mrb[35].mxu0 }
 0x80c   :  { %v896_v16 = vpop.eup %895 }
 0x80d   :  { %v619_v19 = vrot.slane %v896_v16, 1 }
 0x80f   :  { %v634_v20 = vsel %vm633_vm10, %v632_v7, %v619_v19 }
 0x810   :  { %v639_v21 = vmul.f32 %v638_v18, %v634_v20 }
 0x812   :  { %v640_v22 = vsel %vm182_vm2, %v639_v21, 0.0 }
 0x813   :  { %641 = vadd.xlane.f32.xlu0 %v640_v22 }
 0x8a0   :  { %v642_v24 = vpop.xlane.xlu0 %641 }
 0x8a1   :  { %v647_v25 = vadd.f32 %v646_v4, %v642_v24 }
 0x8a3   :  { %650 = vperm.xlu0 %878, %v647_v25  }
 0x922   :  { %v651_v27 = vpop.permute.xlu0 %650 }
 0x923   :  { %653 = vst [vmem:[%s1155_s2] sm:$0xff] %v651_v27 }

</bundles_post_ra>
